<compile_context>
chip_gen: v7x
topology: tpu7x:2x2x1
jax: 0.10.0
libtpu: 0.0.40
codegen_flags: <defaults>
</compile_context>

<pallas_src>
import functools

import jax
import jax.numpy as jnp
from jax import lax
from jax.experimental import pallas as pl
from jax.experimental.pallas import tpu as pltpu

_EPS = 1e-12          # F.normalize default eps (clamp on the L2 norm)
_MAX_TILE_HW = 4096   # cap on lane-tile size; keeps VMEM bounded on v7x


# ----------------------------------------------------------------------------
# Pallas kernel
# ----------------------------------------------------------------------------
def _rmsnorm_kernel(x_ref, g_ref, o_ref, *, scale):
    """RMS-normalize one (C, TILE_HW) slab over the channel axis.

    x_ref : (1, C, TILE_HW)  activations (channels on sublanes, HW on lanes)
    g_ref : (C, 1)           learned per-channel gain
    o_ref : (1, C, TILE_HW)
    """
    x = x_ref[0].astype(jnp.float32)                       # (C, TILE_HW)
    sumsq = jnp.sum(x * x, axis=0, keepdims=True)          # (1, TILE_HW)
    # 1 / max(sqrt(sumsq), eps) == rsqrt(max(sumsq, eps^2))  (sqrt monotone)
    inv = lax.rsqrt(jnp.maximum(sumsq, jnp.float32(_EPS * _EPS)))
    gain = g_ref[...].astype(jnp.float32) * jnp.float32(scale)   # (C, 1)
    o_ref[0] = (x * inv * gain).astype(o_ref.dtype)


# ----------------------------------------------------------------------------
# pallas_call wrapper
# ----------------------------------------------------------------------------
def _choose_tile_hw(hw):
    """Largest lane-friendly tile (<= cap, multiple of 128) that divides HW."""
    if hw <= _MAX_TILE_HW:
        return hw
    t = _MAX_TILE_HW - (_MAX_TILE_HW % 128)
    while t >= 128:
        if hw % t == 0:
            return t
        t -= 128
    return hw  # fallback: full extent (always legal)


def rmsnorm_forward(x_nchw, g):
    """RMSNorm.forward: x is NCHW, g is (1, C, 1, 1)."""
    n, c, h, w = x_nchw.shape
    hw = h * w
    tile_hw = _choose_tile_hw(hw)
    grid = (n, hw // tile_hw)

    x3 = x_nchw.reshape(n, c, hw)               # free, contiguous view
    g2 = g.reshape(c, 1).astype(jnp.float32)
    scale = float(c) ** 0.5

    kernel = functools.partial(_rmsnorm_kernel, scale=scale)
    out = pl.pallas_call(
        kernel,
        out_shape=jax.ShapeDtypeStruct((n, c, hw), x_nchw.dtype),
        grid=grid,
        in_specs=[
            pl.BlockSpec((1, c, tile_hw), lambda i, j: (i, 0, j)),
            pl.BlockSpec((c, 1), lambda i, j: (0, 0)),
        ],
        out_specs=pl.BlockSpec((1, c, tile_hw), lambda i, j: (i, 0, j)),
        compiler_params=pltpu.CompilerParams(
            dimension_semantics=("parallel", "parallel")),
    )(x3, g2)
    return out.reshape(n, c, h, w)


# ----------------------------------------------------------------------------
# Pure-JAX reference (correctness check)
# ----------------------------------------------------------------------------
def _ref_forward(x_nchw, g):
    norm = jnp.sqrt(jnp.sum(x_nchw.astype(jnp.float32) ** 2,
                            axis=1, keepdims=True))
    y = x_nchw / jnp.maximum(norm, _EPS)
    return (y * g * (x_nchw.shape[1] ** 0.5)).astype(x_nchw.dtype)


# ----------------------------------------------------------------------------
if __name__ == "__main__":
    N, C, H, W = 2, 4, 16, 16

    kx, kg = jax.random.split(jax.random.PRNGKey(0))
    x = jax.random.normal(kx, (N, C, H, W), jnp.float32)
    # module initializes g to ones; perturb it so the gain path is exercised
    g = 1.0 + 0.1 * jax.random.normal(kg, (1, C, 1, 1), jnp.float32)

    out = jax.block_until_ready(rmsnorm_forward(x, g))
    ref = jax.block_until_ready(_ref_forward(x, g))

    assert out.shape == (N, C, H, W), out.shape
    max_diff = float(jnp.max(jnp.abs(out - ref)))
    assert jnp.allclose(out, ref, atol=1e-4, rtol=1e-4), f"max diff {max_diff}"
    print("KERNEL_OK")
</pallas_src>

<mosaic_0001>
module attributes {stable_mosaic.version = 11 : i64} {
  func.func @_rmsnorm_kernel(%arg0: i32, %arg1: i32, %arg2: memref<1x4x256xf32, #tpu.memory_space<vmem>>, %arg3: memref<4x1xf32, #tpu.memory_space<vmem>>, %arg4: memref<1x4x256xf32, #tpu.memory_space<vmem>>) attributes {dimension_semantics = [#tpu.dimension_semantics<parallel>, #tpu.dimension_semantics<parallel>], iteration_bounds = array<i64: 2, 1>, scalar_prefetch = 0 : i64, scratch_operands = 0 : i64, tpu.core_type = #tpu.core_type<tc>, window_params = [{transform_indices = @transform_0, window_bounds = array<i64: 1, 4, 256>}, {pipeline_mode = #tpu.pipeline_mode<synchronous>, transform_indices = @transform_1, window_bounds = array<i64: 4, 1>}, {transform_indices = @transform_2, window_bounds = array<i64: 1, 4, 256>}]} {
    %c0 = arith.constant 0 : index
    %c0_0 = arith.constant 0 : index
    %c0_1 = arith.constant 0 : index
    %0 = vector.load %arg2[%c0, %c0_0, %c0_1] : memref<1x4x256xf32, #tpu.memory_space<vmem>>, vector<1x4x256xf32>
    %1 = vector.shape_cast %0 : vector<1x4x256xf32> to vector<4x256xf32>
    %2 = arith.mulf %1, %1 : vector<4x256xf32>
    %cst = arith.constant dense<0.000000e+00> : vector<256xf32>
    %3 = vector.multi_reduction <add>, %2, %cst [0] : vector<4x256xf32> to vector<256xf32>
    %4 = vector.shape_cast %3 : vector<256xf32> to vector<1x256xf32>
    %cst_2 = arith.constant 1.000000e-24 : f32
    %5 = vector.broadcast %cst_2 : f32 to vector<1x256xf32>
    %6 = arith.maximumf %4, %5 : vector<1x256xf32>
    %7 = math.rsqrt %6 : vector<1x256xf32>
    %c0_3 = arith.constant 0 : index
    %c0_4 = arith.constant 0 : index
    %8 = vector.load %arg3[%c0_3, %c0_4] : memref<4x1xf32, #tpu.memory_space<vmem>>, vector<4x1xf32>
    %cst_5 = arith.constant 2.000000e+00 : f32
    %9 = vector.broadcast %cst_5 : f32 to vector<4x1xf32>
    %10 = arith.mulf %8, %9 : vector<4x1xf32>
    %11 = vector.broadcast %7 : vector<1x256xf32> to vector<4x256xf32>
    %12 = arith.mulf %1, %11 : vector<4x256xf32>
    %13 = vector.broadcast %10 : vector<4x1xf32> to vector<4x256xf32>
    %14 = arith.mulf %12, %13 : vector<4x256xf32>
    %c0_6 = arith.constant 0 : index
    %c0_7 = arith.constant 0 : index
    %c0_8 = arith.constant 0 : index
    %15 = vector.load %arg4[%c0_6, %c0_7, %c0_8] : memref<1x4x256xf32, #tpu.memory_space<vmem>>, vector<1x4x256xf32>
    %16 = vector.shape_cast %15 : vector<1x4x256xf32> to vector<4x256xf32>
    %17 = vector.shape_cast %14 : vector<4x256xf32> to vector<1x4x256xf32>
    tpu.vector_store %arg4[%c0_6, %c0_7, %c0_8], %17 {strides = array<i32>} : memref<1x4x256xf32, #tpu.memory_space<vmem>>, vector<1x4x256xf32>,
    return
  }
  func.func @transform_0(%arg0: i32, %arg1: i32) -> (i32, i32, i32) {
    %c0_i32 = arith.constant 0 : i32
    %c0_i32_0 = arith.constant 0 : i32
    return %arg0, %c0_i32, %arg1 : i32, i32, i32
  }
  func.func @transform_1(%arg0: i32, %arg1: i32) -> (i32, i32) {
    %c0_i32 = arith.constant 0 : i32
    %c0_i32_0 = arith.constant 0 : i32
    %c0_i32_1 = arith.constant 0 : i32
    return %c0_i32, %c0_i32_0 : i32, i32
  }
  func.func @transform_2(%arg0: i32, %arg1: i32) -> (i32, i32, i32) {
    %c0_i32 = arith.constant 0 : i32
    %c0_i32_0 = arith.constant 0 : i32
    return %arg0, %c0_i32, %arg1 : i32, i32, i32
  }
}

</mosaic_0001>

<bundles_post_ra>
// kernel: tpu_custom_call.1
= control target key start
LH: loop header
LB: loop body
LE: loop exit
PB: predicated region body
PF: predicated region fallthrough
CT: control target
= control target key end

     0   :  { %7 = vsyncpa [#allocation3], 0  ;;  %s724_s0 = inlined_call_operand.hbm [shape: f32[2,4,256], index: 0, kind: input, shape index: {}]   ;;  %s725_s1 = inlined_call_operand.vmem [shape: f32[4,1], index: 1, kind: input, shape index: {}]   ;;  %s726_s2 = inlined_call_operand.hbm [shape: f32[2,4,256], index: 2, kind: output, shape index: {}]  }
   0x1   :  { %9 = vsyncpa [#allocation3 + $0x1], 0 }
   0x2   :  { %10 = vsyncpa [#allocation4], 0 }
   0x3   :  { %12 = vsyncpa [#allocation4 + $0x1], 0  ;;  %s545_s9 = smov 0   ;;  %s547_s10 = smov 0  }
   0x4   :  { %s549_s11 = smov 0   ;;  %s551_s12 = smov 0  }
   0x5   :  { %s553_s13 = smov 0   ;;  %s555_s14 = smov 0  }
   0x6 LB: > { %s326_s15 = sadd.s32 4294967295, %s524_s14   ;;  %s327_s16 = sadd.s32 4294967294, %s524_s14   ;;  %s524_s14 = sphi %s555_s14, %s18_s14   ;;  %s520_s13 = sphi %s553_s13, %s742_s13   ;;  %s516_s12 = sphi %s551_s12, %s741_s12   ;;  %s512_s11 = sphi %s549_s11, %s740_s11   ;;  %s508_s10 = sphi %s547_s10, %s739_s10   ;;  %s504_s9 = sphi %s545_s9, %s738_s9  }
   0x7   : > { %s30_s17 = sadd.s32 1, %s520_s13  ;;  %s39_s18 = sadd.s32 1, %s512_s11 }
   0x8   : > { %p32_p0 = scmp.ge.s32.totalorder %s30_s17, 2  ;;  %p46_p1 = scmp.ne.s32.totalorder %s512_s11, %s508_s10 }
   0x9   : > { %p47_p2 = scmp.eq.s32.totalorder %s524_s14, 0  ;;  %p52_p3 = scmp.ne.s32.totalorder %s508_s10, %s504_s9 }
   0xa   : > { %s744_s17 = smov (%p32_p0, %s30_s17), 0  ;;  %p53_p5 = scmp.eq.s32.totalorder %s326_s15, 0 }
   0xb   : > { %p586_p4 = por %p47_p2, %p46_p1  ;;  %s34_s20 = ssub.s32 %s520_s13, %s744_s17 }
   0xc   : > { %p99_p6 = scmp.eq.s32.totalorder %s326_s15, 1  ;;  %p37_p7 = scmp.eq.s32.totalorder %s34_s20, 0 }
   0xd   : > { %p592_p8 = por %p53_p5, %p52_p3  ;;  %p105_p10 = scmp.eq.s32.totalorder %s327_s16, 1 }
   0xe   : > { %p596_p9 = por %p99_p6, %p46_p1  ;;  %p355_p13 = scmp.lt.s32.totalorder %s524_s14, 2 }
   0xf   : > { %s601_s23 = scalar_select %p37_p7, %s512_s11, %s39_s18  }
  0x10   : > { %s730_s22 = scalar_select %p596_p9, 1, 0 }
  0x11   : > { %p603_p11 = por %p105_p10, %p52_p3  ;;  %s128_s25 = sand.u32 1, %s512_s11  }
  0x12   : > { %s330_s26 = sshll.u32 %s128_s25, 3  ;;  %s341_s27 = sshll.u32 %s520_s13, 7 }
  0x13   : > { %s731_s24 = scalar_select %p603_p11, 1, 0 }
  0x14   : > { %s614_s30 = scalar_lea.hbm %s724_s0, %s341_s27  ;;  %s132_s3 = scalar_lea.vmem [#allocation2], %s330_s26 }
  0x15   : > { %s142_s4 = sshll.u32 %s132_s3, 4  ;;  %p620_p0 = pnand %p355_p13, %p586_p4  ;;  %s616_s4 = int_to_ptr.vmem [resolvable:$true] %s142_s4 }
  0x16   : > { %s129_s6 = scalar_lea.sflag [#allocation3], %s128_s25  ;;  %s412_s7 = scalar_lea.hbm %s614_s30, 128 }
  0x17   : > { %p413_p3 = scmp.ne.s32.totalorder %s614_s30, %s412_s7  ;;  %p414_p5 = pneg %p620_p0 }
  0x18   : > { %s417_s16 = scalar_lea.hbm %s724_s0, 256  ;;  %p418_p4 = scmp.lt.u32.totalorder %s614_s30, %s724_s0 }
  0x19   : > { %p415_p6 = pnand %p414_p5, %p413_p3  ;;  %p419_p10 = scmp.lt.u32.totalorder %s417_s16, %s412_s7 }
  0x1a   : > { %p421_p12 = scmp.lt.u32.totalorder %s412_s7, %s614_s30 }
  0x1b   : > { %p416_p7 = pneg %p415_p6  ;;  %p420_p13 = por %p419_p10, %p418_p4 }
  0x1d   : > { %p422_p1 = por %p421_p12, %p420_p13 }
  0x1f   : > { %p423_p2 = pnand %p422_p1, %p416_p7 }
  0x21   : > { %426 = shalt.err (!%p423_p2)
}
  0x22   : > { %s427_s20 = scalar_lea.vmem %s616_s4, 128  ;;  %s526_s25 = smov [#allocation2]  }
  0x23   : > { %p428_p3 = scmp.ne.s32.totalorder %s616_s4, %s427_s20  ;;  %s432_s26 = sshll.u32 %s526_s25, 4  ;;  %s433_s26 = int_to_ptr.vmem [resolvable:$false] %s432_s26 }
  0x24   : > { %s434_s27 = scalar_lea.vmem %s433_s26, 256  ;;  %p435_p9 = scmp.lt.s32.totalorder %s616_s4, %s433_s26 }
  0x25   : > { %p430_p6 = pnand %p428_p3, %p414_p5  ;;  %p436_p4 = scmp.lt.s32.totalorder %s434_s27, %s427_s20 }
  0x27   : > { %p431_p11 = pneg %p430_p6  ;;  %p437_p10 = por %p436_p4, %p435_p9 }
  0x29   : > { %p438_p12 = pnand %p437_p10, %p431_p11 }
  0x2b   : > { %441 = shalt.err (!%p438_p12)
}
  0x2c   : > { %350 = dma.hbm_to_vmem [thread:$0]  (!%p620_p0), %s614_s30, 128, %s616_s4, %s129_s6  }
  0x2d   : > { %p733_p1 = scmp.lt.s32.totalorder %s524_s14, 3  ;;  %p734_p2 = scmp.ge.s32.totalorder %s524_s14, 1 }
  0x2f   : > { %p148_p5 = pnand %p734_p2, %p733_p1 }
  0x30   : > { %s656_s28 = sand.u32 (!%p148_p5), 1, %s508_s10  }
  0x31   : > { %151 = sbr.rel (%p148_p5) target bundleno = 206 (0xce), region = 28  ;;  %s334_s29 = sshll.u32 (!%p148_p5), %s656_s28, 3 }
  0x32   : > { %s154_s3 = scalar_lea.sflag (!%p148_p5), [#allocation3], %s656_s28  ;;  %s157_s5 = scalar_lea.vmem (!%p148_p5), [#allocation2], %s334_s29 }
  0x38   : > { %495 = dma.done.wait (%p592_p8), %s154_s3, 128  }
  0x39   : > { %497 = vsyncadd (%p592_p8), %s154_s3, 4294967168  ;;  %v527_v0 = vmov 0   ;;  %v204_v1 = vld [vmem:[%s725_s1] sm:$0xf]  ;;  %vm185_vm0 = vcmask 1043456   ;;  %v218_v24 = vlaneseq  ;;  %s342_s21 = sshll.u32 %s516_s12, 7 }
  0x3a   : > { %407 = vset.pattern.permute.xlu0 %v527_v0  ;;  %v205_v2 = vmul.f32 2.0, %v204_v1  ;;  %v180_v3 = vld [vmem:[%s157_s5] sm:$0xff]  ;;  %v528_v22 = vmov 839922192   ;;  %s177_s6 = scalar_lea.vmem [#allocation5], %s334_s29  ;;  %s675_s16 = scalar_lea.hbm %s726_s2, %s342_s21 }
  0x3b   : > { %v181_v4 = vmul.f32 %v180_v3, %v180_v3  ;;  %v216_v23 = vunpack.c.l.s4 %v528_v22  ;;  %v219_v28 = vshrl.u32 %v218_v24, 7  ;;  %s242_s7 = sshll.u32 %s177_s6, 4  ;;  %s226_s18 = scalar_lea.sflag [#allocation4], %s656_s28  ;;  %s677_s7 = int_to_ptr.vmem [resolvable:$true] %s242_s7 }
  0x3c   : > { %213 = vperm.xlu0 %407, %v205_v2   ;;  %s442_s19 = scalar_lea.vmem %s677_s7, 128  ;;  %p735_p9 = scmp.ne.s32.totalorder %s730_s22, 0 }
  0x3d   : > { %v183_v5 = vcombine.high %v181_v4, %v181_v4  ;;  %v186_v6 = vsel %vm185_vm0, %v181_v4, 0.0  ;;  %v217_v27 = vunpack.c.0.s8 %v216_v23  ;;  %p443_p8 = scmp.ne.s32.totalorder %s677_s7, %s442_s19  ;;  %s529_s12 = smov [#allocation5]  }
  0x3e   : > { %v187_v8 = vrot.slane %v186_v6, 4  ;;  %s446_s20 = sshll.u32 %s529_s12, 4  ;;  %s447_s20 = int_to_ptr.vmem [resolvable:$false] %s446_s20 }
  0x3f   : > { %v193_v7 = vsel %vm185_vm0, %v183_v5, 0.0  ;;  %v220_v30 = vsub.s32 %v217_v27, %v219_v28  ;;  %p444_p11 = pnand %p443_p8, %p735_p9  ;;  %s448_s25 = scalar_lea.vmem %s447_s20, 256 }
  0x40   : > { %v194_v9 = vrot.slane %v193_v7, 4  ;;  %v188_v10 = vadd.f32 %v187_v8, %v186_v6  ;;  %p449_p7 = scmp.lt.s32.totalorder %s677_s7, %s447_s20  ;;  %p450_p13 = scmp.lt.s32.totalorder %s448_s25, %s442_s19 }
  0x41   : > { %p445_p0 = pneg %p444_p11 }
  0x42   : > { %v195_v11 = vadd.f32 %v194_v9, %v193_v7  ;;  %v189_v12 = vrot.slane %v188_v10, 2  ;;  %p451_p3 = por %p450_p13, %p449_p7 }
  0x44   : > { %v196_v13 = vrot.slane %v195_v11, 2  ;;  %v190_v14 = vadd.f32 %v189_v12, %v188_v10  ;;  %p452_p6 = pnand %p451_p3, %p445_p0 }
  0x46   : > { %v197_v15 = vadd.f32 %v196_v13, %v195_v11  ;;  %v191_v16 = vrot.slane %v190_v14, 1 }
  0x48   : > { %v198_v17 = vrot.slane %v197_v15, 1  ;;  %v192_v18 = vadd.f32 %v191_v16, %v190_v14 }
  0x4a   : > { %v199_v19 = vadd.f32 %v198_v17, %v197_v15  ;;  %v200_v20 = vmax.f32 %v192_v18, 1e-24 }
  0x4c   : > { %v201_v21 = vmax.f32 %v199_v19, 1e-24  ;;  %408 = vrsqrt.f32 %v200_v20 }
  0x4e   : > { %410 = vrsqrt.f32 %v201_v21 }
  0x56   : > { %v409_v25 = vpop.eup %408 }
  0x58   : > { %v411_v26 = vpop.eup %410 }
  0x59   : > { %v208_v29 = vcombine.low %v409_v25, %v411_v26 }
  0x5b   : > { %v210_v31 = vmul.f32 %v208_v29, %v180_v3 }
  0xbb   : > { %v214_v32 = vpop.permute.xlu0 %213 }
  0xbc   : > { %v221_v33 = vrot.slane %v214_v32, %v220_v30 }
  0xbe   : > { %v223_v34 = vmul.f32 %v221_v33, %v210_v31 }
  0xc0   : > { %224 = vst [vmem:[%s177_s6] sm:$0xff] %v223_v34 }
  0xc1   : > { %455 = shalt.err (!%p452_p6)
}
  0xc2   : > { %s456_s26 = scalar_lea.hbm %s675_s16, 128  ;;  %s460_s29 = scalar_lea.hbm %s726_s2, 256 }
  0xc3   : > { %p457_p4 = scmp.ne.s32.totalorder %s675_s16, %s456_s26  ;;  %p461_p1 = scmp.lt.u32.totalorder %s675_s16, %s726_s2 }
  0xc4   : > { %p462_p2 = scmp.lt.u32.totalorder %s460_s29, %s456_s26  ;;  %p464_p8 = scmp.lt.u32.totalorder %s456_s26, %s675_s16 }
  0xc5   : > { %p458_p10 = pnand %p457_p4, %p735_p9 }
  0xc6   : > { %p463_p5 = por %p462_p2, %p461_p1 }
  0xc7   : > { %p459_p12 = pneg %p458_p10 }
  0xc8   : > { %p465_p11 = por %p464_p8, %p463_p5 }
  0xca   : > { %p466_p0 = pnand %p465_p11, %p459_p12 }
  0xcc   : > { %469 = shalt.err (!%p466_p0)
}
  0xcd   : > { %345 = dma.vmem_to_hbm [thread:$0]  (%p735_p9), %s677_s7, 128, %s675_s16, %s226_s18  }
  0xce PF: > { %s254_s30 = sand.u32 1, %s504_s9   ;;  %p736_p7 = scmp.ne.s32.totalorder %s731_s24, 0 }
  0xcf   : > { %p737_p13 = scmp.ge.s32.totalorder %s524_s14, 2  ;;  %s255_s4 = scalar_lea.sflag [#allocation4], %s254_s30 }
  0xd1   : > { %p352_p3 = pnand %p737_p13, %p736_p7 }
  0xd3   : > { %499 = dma.done.wait (!%p352_p3), %s255_s4, 128  }
  0xd4   : > { %501 = vsyncadd (!%p352_p3), %s255_s4, 4294967168  ;;  %s18_s14 = sadd.s32 1, %s524_s14   ;;  %s738_s9 = smov %s508_s10 }
  0xd5   : > { %p15_p6 = scmp.ge.s32.totalorder %s18_s14, 4   ;;  %s739_s10 = smov %s512_s11 }
  0xd6   : > { %s740_s11 = smov %s601_s23  ;;  %s741_s12 = smov %s520_s13 }
  0xd7   : > { %s742_s13 = smov %s744_s17  ;;  %17 = sbr.rel (!%p15_p6) target bundleno = 6 (0x6), region = 73 }
  0xde   :  { %260 = vsyncpa [#allocation3], 1 }
  0xdf   :  { %262 = vsyncpa [#allocation3 + $0x1], 1 }
  0xe0   :  { %263 = vsyncpa [#allocation4], 1 }
  0xe1   :  { %265 = vsyncpa [#allocation4 + $0x1], 1 }

</bundles_post_ra>
